<compile_context>
chip_gen: v6e
topology: v6e:2x2x1
jax: 0.10.0
libtpu: 0.0.40
codegen_flags: <defaults>
</compile_context>

<pallas_src>
import functools

import jax
import jax.numpy as jnp
from jax.experimental import pallas as pl
from jax.experimental.pallas import tpu as pltpu


def _sigmoid_kernel(c_ref, x_ref, o_ref, *, unit_exponent):
    # c_ref: (7,) f32 scalars in SMEM: [c1, c2, c3, a=-c4*c5, b=-c4*c6, c7, c8]
    # x_ref/o_ref: (block_rows, LANE_N) tiles in VMEM (original dtype).
    x = x_ref[...].astype(jnp.float32)            # upcast only inside the kernel
    e = jnp.exp(c_ref[3] * x + c_ref[4])          # exp(a*x + b)
    base = c_ref[1] + c_ref[2] * e                # c2 + c3*exp(...)
    if unit_exponent:
        # c7 == 1.0 fast path: exact divide, no pow (log+exp) on the EUP.
        y = c_ref[0] / base + c_ref[6]
    else:
        y = c_ref[0] / jnp.power(base, c_ref[5]) + c_ref[6]
    o_ref[...] = y.astype(o_ref.dtype)


@functools.partial(
    jax.jit, static_argnames=("unit_exponent", "tile_rows", "lane_n")
)
def _forward_impl(x, params, *, unit_exponent, tile_rows, lane_n):
    orig_shape = x.shape
    orig_dtype = x.dtype

    # Fold scalar algebra once (cheap scalar ops in the wrapper).
    p = params.astype(jnp.float32)
    c1, c2, c3, c4, c5, c6, c7, c8 = (p[i] for i in range(8))
    sc = jnp.stack([c1, c2, c3, -c4 * c5, -c4 * c6, c7, c8])

    # Lane-dense slab: flatten, pad only the 1D tail if needed, reshape.
    flat = x.reshape(-1)
    total = flat.shape[0]
    pad = (-total) % lane_n
    if pad:
        flat = jnp.pad(flat, (0, pad))
    rows = flat.shape[0] // lane_n
    x2d = flat.reshape(rows, lane_n)

    block_rows = min(tile_rows, rows)             # full-dim block if rows < tile
    grid = (pl.cdiv(rows, block_rows),)           # ragged last block is clipped

    out2d = pl.pallas_call(
        functools.partial(_sigmoid_kernel, unit_exponent=unit_exponent),
        out_shape=jax.ShapeDtypeStruct((rows, lane_n), orig_dtype),
        grid=grid,
        in_specs=[
            pl.BlockSpec(memory_space=pltpu.SMEM),              # scalars, untiled
            pl.BlockSpec((block_rows, lane_n), lambda i: (i, 0)),
        ],
        out_specs=pl.BlockSpec((block_rows, lane_n), lambda i: (i, 0)),
        compiler_params=pltpu.CompilerParams(
            dimension_semantics=("parallel",),    # lets v7x shard rows over 2 TCs
        ),
    )(sc, x2d)

    out_flat = out2d.reshape(-1)
    if pad:
        out_flat = out_flat[:total]
    return out_flat.reshape(orig_shape)


def model_sigmoid_forward(x, params, tile_rows=512, lane_n=1024):
    """x: any-shaped float array (e.g. NCHW). params: (8,) [c1..c8]."""
    # Static specialization for the c7 == 1.0 default (only when params are
    # concrete; falls back to the generic pow path under tracing).
    try:
        unit_exponent = bool(float(params[6]) == 1.0)
    except Exception:
        unit_exponent = False
    return _forward_impl(
        x,
        params,
        unit_exponent=unit_exponent,
        tile_rows=int(tile_rows),
        lane_n=int(lane_n),
    )


def make_params(c1=10.5, c2=3.0, c3=1.0, c4=1.0, c5=1.0, c6=-22.0, c7=1.0, c8=1.0):
    # Deterministic parameter initialization matching model_sigmoid.__init__.
    return jnp.array([c1, c2, c3, c4, c5, c6, c7, c8], dtype=jnp.float32)


if __name__ == "__main__":
    key = jax.random.PRNGKey(0)
    # Small NCHW input consistent with a typical use of the module.
    x = jax.random.normal(key, (2, 4, 16, 16), dtype=jnp.float32) * 10.0 + 22.0
    params = make_params()

    y = model_sigmoid_forward(x, params)
    y = jax.block_until_ready(y)

    # Reference check in plain JAX (same math as the PyTorch forward).
    c1, c2, c3, c4, c5, c6, c7, c8 = (params[i] for i in range(8))
    y_ref = c1 / jnp.power(c2 + c3 * jnp.exp(-c4 * (c5 * x + c6)), c7) + c8
    assert y.shape == x.shape
    assert y.dtype == x.dtype
    assert jnp.allclose(y, y_ref, rtol=1e-5, atol=1e-5)

    print("KERNEL_OK")
</pallas_src>

<mosaic_0001>
module attributes {stable_mosaic.version = 11 : i64} {
  func.func @_sigmoid_kernel(%arg0: i32, %arg1: memref<7xf32, #tpu.memory_space<smem>>, %arg2: memref<2x1024xf32, #tpu.memory_space<vmem>>, %arg3: memref<2x1024xf32, #tpu.memory_space<vmem>>) attributes {dimension_semantics = [#tpu.dimension_semantics<parallel>], iteration_bounds = array<i64: 1>, scalar_prefetch = 0 : i64, scratch_operands = 0 : i64, tpu.core_type = #tpu.core_type<tc>, window_params = [{transform_indices = @transform_0, window_bounds = array<i64: 7>}, {transform_indices = @transform_1, window_bounds = array<i64: 2, 1024>}, {transform_indices = @transform_2, window_bounds = array<i64: 2, 1024>}]} {
    %c0 = arith.constant 0 : index
    %c0_0 = arith.constant 0 : index
    %0 = vector.load %arg2[%c0, %c0_0] : memref<2x1024xf32, #tpu.memory_space<vmem>>, vector<2x1024xf32>
    %c3 = arith.constant 3 : index
    %1 = memref.load %arg1[%c3] : memref<7xf32, #tpu.memory_space<smem>>
    %2 = vector.broadcast %1 : f32 to vector<2x1024xf32>
    %3 = arith.mulf %2, %0 : vector<2x1024xf32>
    %c4 = arith.constant 4 : index
    %4 = memref.load %arg1[%c4] : memref<7xf32, #tpu.memory_space<smem>>
    %5 = vector.broadcast %4 : f32 to vector<2x1024xf32>
    %6 = arith.addf %3, %5 : vector<2x1024xf32>
    %7 = math.exp %6 : vector<2x1024xf32>
    %c1 = arith.constant 1 : index
    %8 = memref.load %arg1[%c1] : memref<7xf32, #tpu.memory_space<smem>>
    %c2 = arith.constant 2 : index
    %9 = memref.load %arg1[%c2] : memref<7xf32, #tpu.memory_space<smem>>
    %10 = vector.broadcast %9 : f32 to vector<2x1024xf32>
    %11 = arith.mulf %10, %7 : vector<2x1024xf32>
    %12 = vector.broadcast %8 : f32 to vector<2x1024xf32>
    %13 = arith.addf %12, %11 : vector<2x1024xf32>
    %c0_1 = arith.constant 0 : index
    %14 = memref.load %arg1[%c0_1] : memref<7xf32, #tpu.memory_space<smem>>
    %15 = vector.broadcast %14 : f32 to vector<2x1024xf32>
    %16 = arith.divf %15, %13 : vector<2x1024xf32>
    %c6 = arith.constant 6 : index
    %17 = memref.load %arg1[%c6] : memref<7xf32, #tpu.memory_space<smem>>
    %18 = vector.broadcast %17 : f32 to vector<2x1024xf32>
    %19 = arith.addf %16, %18 : vector<2x1024xf32>
    %c0_2 = arith.constant 0 : index
    %c0_3 = arith.constant 0 : index
    %20 = vector.load %arg3[%c0_2, %c0_3] : memref<2x1024xf32, #tpu.memory_space<vmem>>, vector<2x1024xf32>
    tpu.vector_store %arg3[%c0_2, %c0_3], %19 {strides = array<i32>} : memref<2x1024xf32, #tpu.memory_space<vmem>>, vector<2x1024xf32>,
    return
  }
  func.func @transform_0(%arg0: i32) -> i32 {
    %c0_i32 = arith.constant 0 : i32
    %c0_i32_0 = arith.constant 0 : i32
    return %c0_i32 : i32
  }
  func.func @transform_1(%arg0: i32) -> (i32, i32) {
    %c0_i32 = arith.constant 0 : i32
    %c0_i32_0 = arith.constant 0 : i32
    return %arg0, %c0_i32 : i32, i32
  }
  func.func @transform_2(%arg0: i32) -> (i32, i32) {
    %c0_i32 = arith.constant 0 : i32
    %c0_i32_0 = arith.constant 0 : i32
    return %arg0, %c0_i32 : i32, i32
  }
}

</mosaic_0001>

<bundles_post_ra>
// kernel: _forward_impl.1
= control target key start
LH: loop header
LB: loop body
LE: loop exit
PB: predicated region body
PF: predicated region fallthrough
CT: control target
= control target key end

     0   :  { %7 = vsyncpa [#allocation3], 0  ;;  %s122_s0 = inlined_call_operand.vmem [shape: f32[7], index: 0, kind: input, shape index: {}]   ;;  %s123_s1 = inlined_call_operand.vmem [shape: f32[2,1024], index: 1, kind: input, shape index: {}]   ;;  %s124_s2 = inlined_call_operand.vmem [shape: f32[2,1024], index: 2, kind: output, shape index: {}]  }
   0x1   :  { %s14_s11 = sshll.u32 %s122_s0, 4  ;;  %s15_s11 = int_to_ptr.vmem [resolvable:$true] %s14_s11 }
   0x2   :  { %s77_s12 = scalar_lea.vmem %s15_s11, 16  ;;  %p82_p1 = scmp.lt.s32.totalorder %s15_s11, %s15_s11 }
   0x3   :  { %p78_p0 = scmp.ne.s32.totalorder %s15_s11, %s77_s12  ;;  %p83_p2 = scmp.lt.s32.totalorder %s77_s12, %s77_s12 }
   0x5   :  { %p84_p3 = por %p83_p2, %p82_p1 }
   0x7   :  { %p85_p4 = pnand %p84_p3, %p78_p0 }
   0x9   :  { %88 = shalt.err (!%p85_p4)
}
   0xa   :  { %s91_s13 = smov [#allocation2]  }
   0xb   :  { %17 = dma.vmem_to_smem %s15_s11, 16, %s91_s13, [#allocation3]  }
   0xc   :  { %89 = dma.done.wait [#allocation3], 16  }
   0xd   :  { %90 = vsyncadd [#allocation3], 4294967280 }
   0xe   :  { %23 = sfence }
   0xf   :  { %s63_s14 = sld [smem:[#allocation2 + $0x3]]  ;;  %v24_v0 = vld [vmem:[%s123_s1] sm:$0xff]  ;;  %v25_v1 = vld [vmem:[%s123_s1 + $0x8] sm:$0xff] }
  0x10   :  { %s64_s15 = sld [smem:[#allocation2 + $0x4]] }
  0x11   :  { %s66_s19 = sld [smem:[#allocation2 + $0x2]] }
  0x12   :  { %s65_s20 = sld [smem:[#allocation2 + $0x1]] }
  0x13   :  { %s46_s1 = sld [smem:[#allocation2]] }
  0x14   :  { %s67_s21 = sld [smem:[#allocation2 + $0x6]] }
  0x15   :  { %v27_v2 = vstv %s63_s14 }
  0x16   :  { %v28_v3 = vmul.f32 %v27_v2, %v24_v0  ;;  %v31_v4 = vstv %s64_s15  ;;  %v29_v5 = vmul.f32 %v27_v2, %v25_v1 }
  0x17   :  { %v40_v10 = vstv %s66_s19 }
  0x18   :  { %v32_v6 = vadd.f32 %v31_v4, %v28_v3  ;;  %v33_v7 = vadd.f32 %v31_v4, %v29_v5  ;;  %v43_v12 = vstv %s65_s20 }
  0x19   :  { %v47_v18 = vstv %s46_s1 }
  0x1a   :  { %v34_v8 = vmul.f32 1.442695, %v32_v6  ;;  %v36_v9 = vmul.f32 1.442695, %v33_v7  ;;  %v53_v20 = vstv %s67_s21 }
  0x1c   :  { %69 = vpow2.f32 %v34_v8 }
  0x1d   :  { %71 = vpow2.f32 %v36_v9 }
  0x29   :  { %v70_v11 = vpop.eup %69 }
  0x2a   :  { %v72_v13 = vpop.eup %71  ;;  %v41_v14 = vmul.f32 %v70_v11, %v40_v10 }
  0x2b   :  { %v42_v15 = vmul.f32 %v72_v13, %v40_v10 }
  0x2c   :  { %v44_v16 = vadd.f32 %v43_v12, %v41_v14 }
  0x2d   :  { %v45_v17 = vadd.f32 %v43_v12, %v42_v15 }
  0x2e   :  { %73 = vrcp.f32 %v44_v16 }
  0x2f   :  { %75 = vrcp.f32 %v45_v17 }
  0x3b   :  { %v74_v19 = vpop.eup %73 }
  0x3c   :  { %v76_v21 = vpop.eup %75  ;;  %v49_v22 = vmul.f32 %v74_v19, %v47_v18 }
  0x3d   :  { %v51_v23 = vmul.f32 %v76_v21, %v47_v18 }
  0x3e   :  { %v54_v24 = vadd.f32 %v53_v20, %v49_v22 }
  0x3f   :  { %v55_v25 = vadd.f32 %v53_v20, %v51_v23 }
  0x40   :  { %56 = vst [vmem:[%s124_s2] sm:$0xff] %v54_v24 }
  0x41   :  { %57 = vst [vmem:[%s124_s2 + $0x8] sm:$0xff] %v55_v25 }
  0x42   :  { %62 = vsyncpa [#allocation3], 1 }

</bundles_post_ra>
